<compile_context>
chip_gen: v5e
topology: v5e:2x2
jax: 0.10.0
libtpu: 0.0.40
codegen_flags: <defaults>
</compile_context>

<pallas_src>
import functools

import jax
import jax.numpy as jnp
from jax.experimental import pallas as pl
from jax.experimental.pallas import tpu as pltpu


def _round_up(x: int, m: int) -> int:
    return ((x + m - 1) // m) * m


def masked_linear_kernel(x_ref, wg_ref, o_ref):
    # x_ref: (bm, bk)   wg_ref: (bk, bn)   o_ref: (bm, bn) f32
    # o_ref's index_map ignores the K grid axis, so the output tile stays
    # resident in VMEM across K and we accumulate into it directly.
    @pl.when(pl.program_id(2) == 0)
    def _init():
        o_ref[...] = jnp.zeros_like(o_ref)

    o_ref[...] += jnp.dot(x_ref[...], wg_ref[...],
                          preferred_element_type=jnp.float32)


def fuse_weights(w, g, *, compute_dtype=jnp.float32):
    """Pre-multiply the mask once (in f32), outside the per-forward path.

    W and G are static per module instance, so this runs once at init time;
    the kernel then streams a single operand WG.
    """
    wg = w.astype(jnp.float32) * g.astype(jnp.float32)
    return wg.astype(compute_dtype)


@functools.partial(jax.jit, static_argnames=("bm", "bn", "bk", "allow_fast_path"))
def linear_layer_forward(x, wg, *, bm=256, bn=512, bk=512, allow_fast_path=True):
    """out = x @ wg where wg = W * G was pre-fused.  Returns float32 (M, N)."""
    M, K = x.shape
    Kw, N = wg.shape
    assert Kw == K, "shape mismatch between x and fused weight"

    # MXU operand dtype: bf16 only if both operands already are (v6e/v7x fast
    # path); otherwise f32. Accumulation / output is always f32.
    if x.dtype == jnp.bfloat16 and wg.dtype == jnp.bfloat16:
        cdt, sub = jnp.bfloat16, 16   # bf16 minimum sublane tile is 16
    else:
        cdt, sub = jnp.float32, 8
    x = x.astype(cdt)
    wg = wg.astype(cdt)

    # Tiny-problem fast path: the whole problem fits in one tile, so there is
    # nothing to pipeline and pallas_call fixed cost would dominate.
    if allow_fast_path and M <= bm and N <= bn and K <= bk:
        return jnp.dot(x, wg, preferred_element_type=jnp.float32)

    # Effective tile sizes (shrink for small dims; lane dims stay multiples of
    # 128, sublane dims dtype-aligned).
    bm_eff = bm if M >= bm else _round_up(M, sub)
    bn_eff = bn if N >= bn else _round_up(N, 128)
    bk_eff = bk if K >= bk else _round_up(K, 128)

    M_pad = _round_up(M, bm_eff)
    N_pad = _round_up(N, bn_eff)
    K_pad = _round_up(K, bk_eff)

    # Pad only what actually needs it (trace-time check: no copy is emitted
    # when shapes are already aligned — normally only x needs runtime padding,
    # since the static WG can be stored pre-aligned).
    if (M_pad, K_pad) != (M, K):
        x = jnp.pad(x, ((0, M_pad - M), (0, K_pad - K)))
    if (K_pad, N_pad) != (K, N):
        wg = jnp.pad(wg, ((0, K_pad - K), (0, N_pad - N)))

    grid = (M_pad // bm_eff, N_pad // bn_eff, K_pad // bk_eff)
    # NOTE(v7x): only when grid[0]*grid[1] >= 2 do the "parallel" axes shard
    # across both TensorCores; tiny shapes take the XLA fast path instead.

    itemsize = jnp.dtype(cdt).itemsize
    cost = pl.CostEstimate(
        flops=2 * M_pad * N_pad * K_pad,
        transcendentals=0,
        bytes_accessed=(grid[1] * M_pad * K_pad * itemsize        # x re-read per N tile
                        + grid[0] * K_pad * N_pad * itemsize      # WG re-read per M tile
                        + M_pad * N_pad * 4),                     # f32 output
    )

    out = pl.pallas_call(
        masked_linear_kernel,
        out_shape=jax.ShapeDtypeStruct((M_pad, N_pad), jnp.float32),
        grid_spec=pltpu.PrefetchScalarGridSpec(
            num_scalar_prefetch=0,
            grid=grid,
            in_specs=[
                pl.BlockSpec((bm_eff, bk_eff), lambda i, j, k: (i, k)),
                pl.BlockSpec((bk_eff, bn_eff), lambda i, j, k: (k, j)),
            ],
            out_specs=pl.BlockSpec((bm_eff, bn_eff), lambda i, j, k: (i, j)),
        ),
        compiler_params=pltpu.CompilerParams(
            dimension_semantics=("parallel", "parallel", "arbitrary"),
            vmem_limit_bytes=48 * 1024 * 1024,   # fits v7x's 64 MiB with headroom
        ),
        cost_estimate=cost,
    )(x, wg)

    if (M_pad, N_pad) != (M, N):
        out = out[:M, :N]
    return out


if __name__ == "__main__":
    key = jax.random.PRNGKey(0)
    kx, kg, kw, kx2, kg2, kw2 = jax.random.split(key, 6)

    # ---- Module-sized test: x (2, 16), base G (16, 8), feature_out=2 -> (16, 16).
    M, K, N0, feature_out = 2, 16, 8, 2
    x = jax.random.normal(kx, (M, K), dtype=jnp.float32)
    g0 = jax.random.normal(kg, (K, N0), dtype=jnp.float32)
    g = jnp.concatenate([g0] * feature_out, axis=1)       # __init__ concat along dim=1
    # W initialized to ones; perturb so the mask multiply is exercised numerically.
    w = jnp.ones_like(g) + 0.1 * jax.random.normal(kw, g.shape, dtype=jnp.float32)

    wg = fuse_weights(w, g)                                # one-shot W*G fusion
    ref = x @ (w * g)                                      # torch.mm(x, W.mul(G))

    # Force the Pallas path even at tiny shapes (single-tile grid).
    out_pallas = jax.block_until_ready(
        linear_layer_forward(x, wg, allow_fast_path=False))
    assert out_pallas.shape == ref.shape == (M, N0 * feature_out)
    assert jnp.allclose(out_pallas, ref, atol=1e-5, rtol=1e-5)

    # Default dispatch: tiny shapes take the XLA fast path; must match too.
    out_fast = jax.block_until_ready(linear_layer_forward(x, wg))
    assert jnp.allclose(out_fast, ref, atol=1e-5, rtol=1e-5)

    # ---- Multi-tile test: non-aligned shapes with small explicit tiles so the
    #      grid has >1 block on every axis (exercises K-axis accumulation into
    #      the resident output tile and M/N blocking + padding/slicing).
    M2, K2, N2 = 160, 272, 200
    x2 = jax.random.normal(kx2, (M2, K2), dtype=jnp.float32)
    g2 = jax.random.normal(kg2, (K2, N2), dtype=jnp.float32)
    w2 = jnp.ones((K2, N2), jnp.float32) + 0.1 * jax.random.normal(
        kw2, (K2, N2), dtype=jnp.float32)
    wg2 = fuse_weights(w2, g2)
    ref2 = x2 @ (w2 * g2)
    out2 = jax.block_until_ready(
        linear_layer_forward(x2, wg2, bm=128, bn=128, bk=128,
                             allow_fast_path=False))
    assert out2.shape == ref2.shape
    assert jnp.allclose(out2, ref2, atol=1e-3, rtol=1e-3)

    # ---- bf16 operand path (v6e/v7x MXU-friendly): mask multiply stays f32
    #      inside fuse_weights, operands fed to the MXU as bf16, f32 accumulate.
    wg2_bf16 = fuse_weights(w2, g2, compute_dtype=jnp.bfloat16)
    out2_bf16 = jax.block_until_ready(
        linear_layer_forward(x2.astype(jnp.bfloat16), wg2_bf16,
                             bm=128, bn=128, bk=128, allow_fast_path=False))
    assert out2_bf16.shape == ref2.shape
    assert jnp.allclose(out2_bf16, ref2, atol=2e-1, rtol=2e-2)

    print("KERNEL_OK")
</pallas_src>

<mosaic_0001>
module attributes {stable_mosaic.version = 11 : i64} {
  func.func @masked_linear_kernel(%arg0: i32, %arg1: i32, %arg2: i32, %arg3: memref<8x128xf32, #tpu.memory_space<vmem>>, %arg4: memref<128x128xf32, #tpu.memory_space<vmem>>, %arg5: memref<8x128xf32, #tpu.memory_space<vmem>>) attributes {dimension_semantics = [#tpu.dimension_semantics<parallel>, #tpu.dimension_semantics<parallel>, #tpu.dimension_semantics<arbitrary>], iteration_bounds = array<i64: 1, 1, 1>, scalar_prefetch = 0 : i64, scratch_operands = 0 : i64, tpu.core_type = #tpu.core_type<tc>, window_params = [{transform_indices = @transform_0, window_bounds = array<i64: 8, 128>}, {transform_indices = @transform_1, window_bounds = array<i64: 128, 128>}, {transform_indices = @transform_2, window_bounds = array<i64: 8, 128>}]} {
    %c0_i32 = arith.constant 0 : i32
    %0 = arith.cmpi eq, %arg2, %c0_i32 : i32
    %1 = arith.extui %0 : i1 to i32
    %c0_i32_0 = arith.constant 0 : i32
    %2 = arith.cmpi ne, %1, %c0_i32_0 : i32
    scf.if %2 {
      %cst_8 = arith.constant 0.000000e+00 : f32
      %9 = vector.broadcast %cst_8 : f32 to vector<8x128xf32>
      %c0_9 = arith.constant 0 : index
      %c0_10 = arith.constant 0 : index
      %10 = vector.load %arg5[%c0_9, %c0_10] : memref<8x128xf32, #tpu.memory_space<vmem>>, vector<8x128xf32>
      tpu.vector_store %arg5[%c0_9, %c0_10], %9 {strides = array<i32>} : memref<8x128xf32, #tpu.memory_space<vmem>>, vector<8x128xf32>,
    } else {
    }
    %c0 = arith.constant 0 : index
    %c0_1 = arith.constant 0 : index
    %3 = vector.load %arg5[%c0, %c0_1] : memref<8x128xf32, #tpu.memory_space<vmem>>, vector<8x128xf32>
    %c0_2 = arith.constant 0 : index
    %c0_3 = arith.constant 0 : index
    %4 = vector.load %arg3[%c0_2, %c0_3] : memref<8x128xf32, #tpu.memory_space<vmem>>, vector<8x128xf32>
    %c0_4 = arith.constant 0 : index
    %c0_5 = arith.constant 0 : index
    %5 = vector.load %arg4[%c0_4, %c0_5] : memref<128x128xf32, #tpu.memory_space<vmem>>, vector<128x128xf32>
    %cst = arith.constant dense<0.000000e+00> : vector<8x128xf32>
    %6 = tpu.matmul %4, %5, %cst {dimension_numbers = #tpu.dot_dimension_numbers<[1], [0], [0], [1], [0, 0, 1, 1], [], []>} : vector<8x128xf32>, vector<128x128xf32>, vector<8x128xf32> -> vector<8x128xf32>
    %7 = arith.addf %3, %6 : vector<8x128xf32>
    %c0_6 = arith.constant 0 : index
    %c0_7 = arith.constant 0 : index
    %8 = vector.load %arg5[%c0_6, %c0_7] : memref<8x128xf32, #tpu.memory_space<vmem>>, vector<8x128xf32>
    tpu.vector_store %arg5[%c0_6, %c0_7], %7 {strides = array<i32>} : memref<8x128xf32, #tpu.memory_space<vmem>>, vector<8x128xf32>,
    return
  }
  func.func @transform_0(%arg0: i32, %arg1: i32, %arg2: i32) -> (i32, i32) {
    %c0_i32 = arith.constant 0 : i32
    return %arg0, %arg2 : i32, i32
  }
  func.func @transform_1(%arg0: i32, %arg1: i32, %arg2: i32) -> (i32, i32) {
    %c0_i32 = arith.constant 0 : i32
    return %arg2, %arg1 : i32, i32
  }
  func.func @transform_2(%arg0: i32, %arg1: i32, %arg2: i32) -> (i32, i32) {
    %c0_i32 = arith.constant 0 : i32
    return %arg0, %arg1 : i32, i32
  }
}

</mosaic_0001>

<bundles_post_ra>
// kernel: linear_layer_forward.1
= control target key start
LH: loop header
LB: loop body
LE: loop exit
PB: predicated region body
PF: predicated region fallthrough
CT: control target
= control target key end

     0   :  { %s130_s1 = inlined_call_operand.vmem [shape: f32[128,128], index: 1, kind: input, shape index: {}]   ;;  %s131_s0 = inlined_call_operand.vmem [shape: f32[8,128], index: 0, kind: input, shape index: {}]   ;;  %s132_s2 = inlined_call_operand.vmem [shape: f32[8,128], index: 2, kind: output, shape index: {}]  }
   0x1   :  { %v33_v0 = vld [vmem:[%s130_s1 + $0x78] sm:$0xff]  ;;  %v32_v1 = vld [vmem:[%s130_s1 + $0x70] sm:$0xff]  ;;  %v31_v2 = vld [vmem:[%s130_s1 + $0x68] sm:$0xff] }
   0x2   :  { %34 = vmatpush.msra.mxu0 %v33_v0  ;;  %v30_v3 = vld [vmem:[%s130_s1 + $0x60] sm:$0xff]  ;;  %v29_v4 = vld [vmem:[%s130_s1 + $0x58] sm:$0xff]  ;;  %v28_v5 = vld [vmem:[%s130_s1 + $0x50] sm:$0xff] }
   0x3   :  { %v27_v6 = vld [vmem:[%s130_s1 + $0x48] sm:$0xff]  ;;  %v26_v7 = vld [vmem:[%s130_s1 + $0x40] sm:$0xff]  ;;  %v25_v8 = vld [vmem:[%s130_s1 + $0x38] sm:$0xff] }
   0x4   :  { %35 = vmatpush.msra.mxu0 %v32_v1  ;;  %v24_v9 = vld [vmem:[%s130_s1 + $0x30] sm:$0xff]  ;;  %v23_v10 = vld [vmem:[%s130_s1 + $0x28] sm:$0xff]  ;;  %v22_v11 = vld [vmem:[%s130_s1 + $0x20] sm:$0xff] }
   0x5   :  { %v21_v12 = vld [vmem:[%s130_s1 + $0x18] sm:$0xff]  ;;  %v20_v13 = vld [vmem:[%s130_s1 + $0x10] sm:$0xff]  ;;  %v19_v14 = vld [vmem:[%s130_s1 + $0x8] sm:$0xff] }
   0x6   :  { %36 = vmatpush.msra.mxu0 %v31_v2  ;;  %v18_v15 = vld [vmem:[%s130_s1] sm:$0xff] }
   0x7   :  { %v17_v16 = vld [vmem:[%s131_s0] sm:$0xff] }
   0x8   :  { %37 = vmatpush.msra.mxu0 %v30_v3 }
   0xa   :  { %38 = vmatpush.msra.mxu0 %v29_v4 }
   0xc   :  { %39 = vmatpush.msra.mxu0 %v28_v5 }
   0xe   :  { %40 = vmatpush.msra.mxu0 %v27_v6 }
  0x10   :  { %41 = vmatpush.msra.mxu0 %v26_v7 }
  0x12   :  { %42 = vmatpush.msra.mxu0 %v25_v8 }
  0x14   :  { %43 = vmatpush.msra.mxu0 %v24_v9 }
  0x16   :  { %44 = vmatpush.msra.mxu0 %v23_v10 }
  0x18   :  { %45 = vmatpush.msra.mxu0 %v22_v11 }
  0x1a   :  { %46 = vmatpush.msra.mxu0 %v21_v12 }
  0x1c   :  { %47 = vmatpush.msra.mxu0 %v20_v13 }
  0x1e   :  { %48 = vmatpush.msra.mxu0 %v19_v14 }
  0x20   :  { %49 = vmatpush.msra.mxu0 %v18_v15 }
  0x21   :  { %50 = vmatmul.f32.vlgmr.msra.gmra.mxu0 %v17_v16 }
  0x9e   :  { %v51_v17 = vpop.f32.mrf.mxu0 }
  0x9f   :  { %55 = vst [vmem:[%s132_s2] sm:$0xff] %v51_v17 }

</bundles_post_ra>
